<compile_context>
chip_gen: v7x
topology: tpu7x:2x2x1
jax: 0.10.0
libtpu: 0.0.40
codegen_flags: <defaults>
</compile_context>

<pallas_src>
import functools

import numpy as np
import jax
import jax.numpy as jnp
from jax import lax
from jax.experimental import pallas as pl
from jax.experimental.pallas import tpu as pltpu

HV_DIM = 10000                 # matches random_bipolar_hv(10000) in the PyTorch module
SUBLANES = 8
LANES = 1280                   # 10 * 128
HV_DIM_PAD = SUBLANES * LANES  # 10240


# ---------------------------------------------------------------------------
# Hardware queries (with safe fallbacks)
# ---------------------------------------------------------------------------
def _vmem_capacity_bytes():
    try:
        return int(pltpu.get_tpu_info().vmem_capacity_bytes)
    except Exception:
        kind = ""
        try:
            kind = jax.devices()[0].device_kind.lower()
        except Exception:
            pass
        return (64 << 20) if ("v7" in kind or "7x" in kind) else (128 << 20)


def _num_tensorcores():
    try:
        kind = jax.devices()[0].device_kind.lower()
    except Exception:
        return 1
    return 2 if ("v7" in kind or "7x" in kind) else 1


# ---------------------------------------------------------------------------
# Path A: per-edge loop kernel (good when E is small relative to num_hvs)
# ---------------------------------------------------------------------------
def _edge_bind_sum_kernel(s_idx_ref, t_idx_ref, h_ref, out_ref, *, unroll):
    """One grid step = one lane-chunk of D for ALL edges.

    s_idx_ref / t_idx_ref : (E,) int32 in SMEM (scalar prefetch)
    h_ref                 : (num_hvs, 8, CHUNK) int32, resident chunk of H
    out_ref               : (8, CHUNK) int32, written once
    """
    num_edges = s_idx_ref.shape[0]

    def body(e, acc):
        # Widening already hoisted to the wrapper: rows are int32 in VMEM.
        return acc + h_ref[s_idx_ref[e]] * h_ref[t_idx_ref[e]]

    acc0 = jnp.zeros(out_ref.shape, jnp.int32)
    if unroll is None or unroll <= 1:
        out_ref[...] = lax.fori_loop(0, num_edges, body, acc0)
    else:
        out_ref[...] = lax.fori_loop(0, num_edges, body, acc0, unroll=unroll)


def _pick_edge_num_chunks(num_hvs, vmem_cap, num_tc):
    # nc=2 (chunk=640) preferred everywhere: the edge loop stays unrollable by 2
    # without vreg spills, and the single "parallel" grid axis splits evenly
    # across v7x's two TensorCores.  Fall back to narrower chunks if VMEM-tight.
    budget = max(vmem_cap - (16 << 20), vmem_cap // 2)
    candidates = (2, 10) if num_tc > 1 else (2, 5, 10)
    for nc in candidates:
        chunk = LANES // nc
        need = 2 * num_hvs * SUBLANES * chunk * 4 + 2 * SUBLANES * chunk * 4 + (4 << 20)
        if need <= budget:
            return nc
    return 10


def _bind_and_sum_edges(H_i8, s_idx, t_idx, num_chunks=None):
    num_hvs, D = H_i8.shape
    assert D == HV_DIM
    vmem_cap = _vmem_capacity_bytes()
    num_tc = _num_tensorcores()

    if num_chunks is None:
        num_chunks = _pick_edge_num_chunks(num_hvs, vmem_cap, num_tc)
    chunk = LANES // num_chunks
    assert LANES % num_chunks == 0 and chunk % 128 == 0

    # Hoisted widening: resident table is int32 when it enters VMEM (an int8
    # block with an 8-sublane second-minor sublane-pads 4x in VMEM anyway, so
    # this costs no extra VMEM; table crosses HBM exactly once).
    H_pad = jnp.pad(H_i8, ((0, 0), (0, HV_DIM_PAD - HV_DIM)))
    H3 = H_pad.astype(jnp.int32).reshape(num_hvs, SUBLANES, LANES)

    num_edges = int(s_idx.shape[0])
    unroll = 4 if chunk <= 256 else (2 if chunk <= 640 else None)

    h_block = num_hvs * SUBLANES * chunk * 4
    out_block = SUBLANES * chunk * 4
    vmem_needed = 2 * h_block + 2 * out_block + (4 << 20)
    vmem_limit = int(min(max(vmem_needed, 32 << 20), vmem_cap - (8 << 20)))

    cost = pl.CostEstimate(
        flops=2 * num_edges * HV_DIM_PAD,
        transcendentals=0,
        bytes_accessed=num_hvs * HV_DIM_PAD * 4 + 8 * num_edges + 4 * HV_DIM_PAD)

    grid_spec = pltpu.PrefetchScalarGridSpec(
        num_scalar_prefetch=2,
        grid=(num_chunks,),
        in_specs=[
            # Whole HV table (current lane chunk) resident in VMEM.
            pl.BlockSpec((num_hvs, SUBLANES, chunk), lambda c, s, t: (0, 0, c)),
        ],
        out_specs=pl.BlockSpec((SUBLANES, chunk), lambda c, s, t: (0, c)),
    )
    out = pl.pallas_call(
        functools.partial(_edge_bind_sum_kernel, unroll=unroll),
        out_shape=jax.ShapeDtypeStruct((SUBLANES, LANES), jnp.int32),
        grid_spec=grid_spec,
        compiler_params=pltpu.CompilerParams(
            dimension_semantics=("parallel",),    # lane chunks are independent
            vmem_limit_bytes=vmem_limit),
        cost_estimate=cost,
    )(s_idx, t_idx, H3)
    return out.reshape(HV_DIM_PAD)[:HV_DIM]


# ---------------------------------------------------------------------------
# Path B: MXU reformulation  result = sum_i H[i] * (C @ H)[i]
# ---------------------------------------------------------------------------
def _mxu_bind_sum_kernel(c_ref, h_ref, out_ref):
    """out[1, chunk] = sum_i H[i, chunk] * (C @ H)[i, chunk]."""
    h = h_ref[...]                                                  # (num_hvs, chunk) bf16
    ch = jnp.dot(c_ref[...], h, preferred_element_type=jnp.float32)  # MXU, f32 accum
    out_ref[...] = jnp.sum(ch * h.astype(jnp.float32),
                           axis=0, keepdims=True).astype(jnp.int32)


def _pick_mxu_chunk(num_hvs, vmem_cap):
    budget = max(vmem_cap - (16 << 20), vmem_cap // 2)
    for chunk in (2560, 1280, 640, 256, 128):       # all divide 10240; even step counts
        need = (2 * num_hvs * chunk * 2             # double-buffered H chunk (bf16)
                + 2 * num_hvs * num_hvs * 2         # C (bf16)
                + 2 * chunk * 4                     # output chunk (int32)
                + (4 << 20))
        if need <= budget:
            return chunk
    return 128


def _bind_and_sum_mxu(H_i8, s_idx, t_idx, chunk=None):
    num_hvs, D = H_i8.shape
    assert D == HV_DIM
    vmem_cap = _vmem_capacity_bytes()
    if chunk is None:
        chunk = _pick_mxu_chunk(num_hvs, vmem_cap)
    assert HV_DIM_PAD % chunk == 0 and chunk % 128 == 0
    num_chunks = HV_DIM_PAD // chunk

    # Pair matrix C[i, j] = #undirected edges (i, j).  Entries are 0/1 after
    # to_undirected -> exact in bf16; +/-1 HVs exact in bf16; MXU accumulates
    # in f32, exact while |result| < 2**24.
    s_j = jnp.asarray(s_idx, jnp.int32)
    t_j = jnp.asarray(t_idx, jnp.int32)
    C = jnp.zeros((num_hvs, num_hvs), jnp.float32).at[s_j, t_j].add(1.0)
    C = C.astype(jnp.bfloat16)
    H_pad = jnp.pad(H_i8, ((0, 0), (0, HV_DIM_PAD - HV_DIM))).astype(jnp.bfloat16)

    vmem_needed = (2 * num_hvs * chunk * 2 + 2 * num_hvs * num_hvs * 2
                   + 2 * chunk * 4 + (4 << 20))
    vmem_limit = int(min(max(vmem_needed, 32 << 20), vmem_cap - (8 << 20)))

    cost = pl.CostEstimate(
        flops=2 * num_hvs * num_hvs * HV_DIM_PAD + 2 * num_hvs * HV_DIM_PAD,
        transcendentals=0,
        bytes_accessed=num_hvs * HV_DIM_PAD * 2 + num_hvs * num_hvs * 2 + 4 * HV_DIM_PAD)

    grid_spec = pltpu.PrefetchScalarGridSpec(
        num_scalar_prefetch=0,
        grid=(num_chunks,),
        in_specs=[
            pl.BlockSpec((num_hvs, num_hvs), lambda c: (0, 0)),   # C resident
            pl.BlockSpec((num_hvs, chunk), lambda c: (0, c)),     # H lane chunk
        ],
        out_specs=pl.BlockSpec((1, chunk), lambda c: (0, c)),
    )
    out = pl.pallas_call(
        _mxu_bind_sum_kernel,
        out_shape=jax.ShapeDtypeStruct((1, HV_DIM_PAD), jnp.int32),
        grid_spec=grid_spec,
        compiler_params=pltpu.CompilerParams(
            dimension_semantics=("parallel",),
            vmem_limit_bytes=vmem_limit),
        cost_estimate=cost,
    )(C, H_pad)
    return out.reshape(HV_DIM_PAD)[:HV_DIM]


# ---------------------------------------------------------------------------
# Dispatcher
# ---------------------------------------------------------------------------
def bind_and_sum(H_i8, s_idx, t_idx, method=None):
    """result[d] = sum_e H[s_idx[e], d] * H[t_idx[e], d]   (int32, d < HV_DIM)."""
    num_hvs = H_i8.shape[0]
    num_edges = int(s_idx.shape[0])
    if method is None:
        vmem_cap = _vmem_capacity_bytes()
        mxu_fits = 2 * num_hvs * num_hvs * 2 <= vmem_cap // 3
        # MXU path replaces E*D VPU ops with a small matmul per lane chunk and
        # avoids SMEM edge-index arrays entirely (SMEM-safe for huge E).
        if mxu_fits and (num_edges >= num_hvs or num_edges > 8192):
            method = "mxu"
        else:
            method = "edge"
    if method == "mxu":
        return _bind_and_sum_mxu(H_i8, s_idx, t_idx)
    return _bind_and_sum_edges(H_i8, s_idx, t_idx)


# ---------------------------------------------------------------------------
# Glue reproducing the rest of Encoder.forward (tiny, shape-dynamic pieces)
# ---------------------------------------------------------------------------
def pagerank_dense(num_nodes, edge_index, alpha=0.85, max_iter=10):
    rows = jnp.asarray(edge_index[0], dtype=jnp.int32)
    cols = jnp.asarray(edge_index[1], dtype=jnp.int32)
    # NOTE: like the PyTorch reference, zero in-degree nodes would yield inf.
    counts = jnp.zeros((num_nodes,), jnp.float32).at[cols].add(1.0)
    vals = alpha / counts[cols]
    # dense scatter-add == uncoalesced sparse COO matvec semantics
    M = jnp.zeros((num_nodes, num_nodes), jnp.float32).at[rows, cols].add(vals)
    v = jnp.full((num_nodes,), 1.0 / num_nodes, jnp.float32)
    p = jnp.full((num_nodes,), (1.0 - alpha) / num_nodes, jnp.float32)
    return lax.fori_loop(0, max_iter, lambda _, v: M @ v + p, v)


def make_node_ids(size, dim=HV_DIM, seed=0):
    # deterministic stand-in for [random_bipolar_hv(10000) for _ in range(size)]
    rng = np.random.default_rng(seed)
    return (rng.integers(0, 2, size=(size, dim)) * 2 - 1).astype(np.int8)


def encoder_preprocess(node_ids, num_nodes, edge_index):
    """Returns (H, s_idx, t_idx) feeding the Pallas binding kernels."""
    pr = pagerank_dense(num_nodes, edge_index, max_iter=10)
    order = jnp.argsort(pr)
    rank = jnp.zeros_like(order).at[order].set(
        jnp.arange(num_nodes, dtype=order.dtype))            # inverse_permutation
    rank_np = np.asarray(rank)

    # to_undirected: sort each (row, col) pair, unique columns (host-side numpy);
    # matches the module's to_undirected (one canonical copy per edge).
    und = np.unique(np.sort(np.asarray(edge_index), axis=0), axis=1)
    row, col = und[0], und[1]

    s_idx = rank_np[row].astype(np.int32)
    t_idx = rank_np[col].astype(np.int32)
    return node_ids, s_idx, t_idx


def encoder_forward(node_ids, num_nodes, edge_index):
    H, s_idx, t_idx = encoder_preprocess(node_ids, num_nodes, edge_index)
    return bind_and_sum(jnp.asarray(H), jnp.asarray(s_idx), jnp.asarray(t_idx))


# ---------------------------------------------------------------------------
if __name__ == "__main__":
    key = jax.random.PRNGKey(0)
    num_nodes = 8

    # Deterministic small directed graph: 12 random edges + a ring so every
    # node has at least one incoming edge (well-formed pagerank, no 1/0).
    k1, k2 = jax.random.split(key)
    src = jax.random.randint(k1, (12,), 0, num_nodes)
    dst = jax.random.randint(k2, (12,), 0, num_nodes)
    ring_src = jnp.arange(num_nodes)
    ring_dst = (jnp.arange(num_nodes) + 1) % num_nodes
    edge_index = np.asarray(
        jnp.stack([jnp.concatenate([src, ring_src]),
                   jnp.concatenate([dst, ring_dst])]).astype(jnp.int32))

    node_ids = make_node_ids(size=num_nodes)  # Encoder(size=num_nodes)

    # Auto-dispatched forward pass.
    out = encoder_forward(node_ids, num_nodes, edge_index)
    out = jax.block_until_ready(out)
    assert out.shape == (HV_DIM,), out.shape

    # Reference check of the hot path against BOTH kernel variants.
    H, s_idx, t_idx = encoder_preprocess(node_ids, num_nodes, edge_index)
    ref = (np.asarray(H)[s_idx].astype(np.int64)
           * np.asarray(H)[t_idx].astype(np.int64)).sum(axis=0)

    out_edge = jax.block_until_ready(
        bind_and_sum(jnp.asarray(H), jnp.asarray(s_idx), jnp.asarray(t_idx),
                     method="edge"))
    out_mxu = jax.block_until_ready(
        bind_and_sum(jnp.asarray(H), jnp.asarray(s_idx), jnp.asarray(t_idx),
                     method="mxu"))

    np.testing.assert_array_equal(np.asarray(out, dtype=np.int64), ref)
    np.testing.assert_array_equal(np.asarray(out_edge, dtype=np.int64), ref)
    np.testing.assert_array_equal(np.asarray(out_mxu, dtype=np.int64), ref)

    print("KERNEL_OK")
</pallas_src>

<mosaic_0001>
module attributes {stable_mosaic.version = 11 : i64} {
  func.func @_mxu_bind_sum_kernel(%arg0: i32, %arg1: memref<8x8xbf16, #tpu.memory_space<vmem>>, %arg2: memref<8x2560xbf16, #tpu.memory_space<vmem>>, %arg3: memref<1x2560xi32, #tpu.memory_space<vmem>>) attributes {dimension_semantics = [#tpu.dimension_semantics<parallel>], iteration_bounds = array<i64: 4>, scalar_prefetch = 0 : i64, scratch_operands = 0 : i64, tpu.core_type = #tpu.core_type<tc>, window_params = [{pipeline_mode = #tpu.pipeline_mode<synchronous>, transform_indices = @transform_0, window_bounds = array<i64: 8, 8>}, {transform_indices = @transform_1, window_bounds = array<i64: 8, 2560>}, {transform_indices = @transform_2, window_bounds = array<i64: 1, 2560>}]} {
    %c0 = arith.constant 0 : index
    %c0_0 = arith.constant 0 : index
    %0 = vector.load %arg2[%c0, %c0_0] : memref<8x2560xbf16, #tpu.memory_space<vmem>>, vector<8x2560xbf16>
    %c0_1 = arith.constant 0 : index
    %c0_2 = arith.constant 0 : index
    %1 = vector.load %arg1[%c0_1, %c0_2] : memref<8x8xbf16, #tpu.memory_space<vmem>>, vector<8x8xbf16>
    %cst = arith.constant dense<0.000000e+00> : vector<8x2560xf32>
    %2 = tpu.matmul %1, %0, %cst {dimension_numbers = #tpu.dot_dimension_numbers<[1], [0], [0], [1], [0, 0, 1, 1], [], []>} : vector<8x8xbf16>, vector<8x2560xbf16>, vector<8x2560xf32> -> vector<8x2560xf32>
    %3 = arith.extf %0 : vector<8x2560xbf16> to vector<8x2560xf32>
    %4 = arith.mulf %2, %3 : vector<8x2560xf32>
    %cst_3 = arith.constant dense<0.000000e+00> : vector<2560xf32>
    %5 = vector.multi_reduction <add>, %4, %cst_3 [0] : vector<8x2560xf32> to vector<2560xf32>
    %6 = vector.shape_cast %5 : vector<2560xf32> to vector<1x2560xf32>
    %7 = arith.fptosi %6 : vector<1x2560xf32> to vector<1x2560xi32>
    %c0_4 = arith.constant 0 : index
    %c0_5 = arith.constant 0 : index
    %8 = vector.load %arg3[%c0_4, %c0_5] : memref<1x2560xi32, #tpu.memory_space<vmem>>, vector<1x2560xi32>
    tpu.vector_store %arg3[%c0_4, %c0_5], %7 {strides = array<i32>} : memref<1x2560xi32, #tpu.memory_space<vmem>>, vector<1x2560xi32>,
    return
  }
  func.func @transform_0(%arg0: i32) -> (i32, i32) {
    %c0_i32 = arith.constant 0 : i32
    %c0_i32_0 = arith.constant 0 : i32
    %c0_i32_1 = arith.constant 0 : i32
    return %c0_i32, %c0_i32_0 : i32, i32
  }
  func.func @transform_1(%arg0: i32) -> (i32, i32) {
    %c0_i32 = arith.constant 0 : i32
    %c0_i32_0 = arith.constant 0 : i32
    return %c0_i32, %arg0 : i32, i32
  }
  func.func @transform_2(%arg0: i32) -> (i32, i32) {
    %c0_i32 = arith.constant 0 : i32
    %c0_i32_0 = arith.constant 0 : i32
    return %c0_i32, %arg0 : i32, i32
  }
}

</mosaic_0001>

<bundles_post_ra>
// kernel: tpu_custom_call.1
= control target key start
LH: loop header
LB: loop body
LE: loop exit
PB: predicated region body
PF: predicated region fallthrough
CT: control target
= control target key end

     0   :  { %7 = vsyncpa [#allocation3], 0  ;;  %s1826_s0 = inlined_call_operand.hbm [shape: bf16[8,8], index: 0, kind: input, shape index: {}]   ;;  %s1827_s1 = inlined_call_operand.hbm [shape: bf16[8,10240], index: 1, kind: input, shape index: {}]   ;;  %s1828_s2 = inlined_call_operand.hbm [shape: s32[1,10240], index: 2, kind: output, shape index: {}]  }
   0x1   :  { %8 = vsyncpa [#allocation6], 0 }
   0x2   :  { %10 = vsyncpa [#allocation6 + $0x1], 0 }
   0x3   :  { %11 = vsyncpa [#allocation4], 0 }
   0x4   :  { %13 = vsyncpa [#allocation4 + $0x1], 0  ;;  %s1442_s9 = smov 0   ;;  %s1444_s10 = smov 0  }
   0x5   :  { %s1446_s11 = smov 0   ;;  %s1448_s12 = smov 0  }
   0x6 LB: > { %s1463_s13 = sadd.s32 4294967295, %s1420_s12   ;;  %s1118_s14 = sadd.s32 4294967294, %s1420_s12   ;;  %s1420_s12 = sphi %s1448_s12, %s1851_s12   ;;  %s1416_s11 = sphi %s1446_s11, %s1850_s11   ;;  %s1412_s10 = sphi %s1444_s10, %s1849_s10   ;;  %s1408_s9 = sphi %s1442_s9, %s1848_s9  }
   0x7   : > { %p60_p0 = scmp.ne.s32.totalorder %s1412_s10, %s1408_s9  ;;  %p1829_p1 = scmp.eq.s32.totalorder %s1463_s13, 0 }
   0x8   : > { %p90_p3 = scmp.eq.s32.totalorder %s1118_s14, 3  ;;  %p1119_p5 = scmp.ge.s32.totalorder %s1420_s12, 1 }
   0x9   : > { %p1472_p4 = por %p1829_p1, %p60_p0  ;;  %p97_p7 = scmp.lt.s32.totalorder %s1420_s12, 5 }
   0xa   : > { %p1477_p6 = por %p90_p3, %p60_p0  ;;  %s1422_s18 = smov [#allocation2]  }
   0xb   : > { %s1832_s15 = scalar_select %p1472_p4, 1, 0 }
   0xc   : > { %s1833_s16 = scalar_select %p1477_p6, 1, 0 }
   0xd   : > { %p1482_p8 = pnand %p1119_p5, %p97_p7  ;;  %s110_s19 = sshll.u32 %s1422_s18, 4  ;;  %s111_s19 = int_to_ptr.vmem [resolvable:$true] %s110_s19 }
   0xe   : > { %s1489_s20 = sadd.s32 1, %s1420_s12   ;;  %s47_s24 = sadd.s32 1, %s1416_s11 }
   0xf   : > { %s1834_s17 = scalar_select %p1482_p8, 1, 0 }
  0x10   : > { %p1221_p9 = pneg %p1482_p8  ;;  %s44_s22 = ssub.s32 %s1420_s12, %s1489_s20 }
  0x11   : > { %p1499_p11 = scmp.eq.s32.totalorder %s44_s22, 0  ;;  %s1292_s27 = scalar_lea.hbm %s1826_s0, 64 }
  0x12   : > { %p1493_p10 = pnand %p1221_p9, %p1829_p1  ;;  %p1293_p13 = scmp.ne.s32.totalorder %s1826_s0, %s1292_s27 }
  0x13   : > { %s1836_s23 = scalar_select %p1499_p11, 1, 0 }
  0x14   : > { %p1294_p0 = pneg %p1493_p10  ;;  %p1299_p7 = scmp.lt.u32.totalorder %s1292_s27, %s1826_s0 }
  0x16   : > { %p1295_p3 = pnand %p1294_p0, %p1293_p13 }
  0x18   : > { %p1296_p5 = pneg %p1295_p3 }
  0x1a   : > { %p1301_p9 = pnand %p1299_p7, %p1296_p5 }
  0x1c   : > { %1304 = shalt.err (!%p1301_p9)
}
  0x1d   : > { %s1305_s4 = scalar_lea.vmem %s111_s19, 64  ;;  %p1313_p6 = scmp.lt.s32.totalorder %s111_s19, %s111_s19 }
  0x1e   : > { %p1306_p1 = scmp.ne.s32.totalorder %s111_s19, %s1305_s4  ;;  %p1314_p4 = scmp.lt.s32.totalorder %s1305_s4, %s1305_s4 }
  0x20   : > { %p1308_p2 = pnand %p1306_p1, %p1294_p0  ;;  %p1315_p8 = por %p1314_p4, %p1313_p6 }
  0x22   : > { %p1309_p12 = pneg %p1308_p2 }
  0x24   : > { %p1316_p11 = pnand %p1315_p8, %p1309_p12 }
  0x26   : > { %1319 = shalt.err (!%p1316_p11)
}
  0x27   : > { %1224 = dma.hbm_to_vmem [thread:$0]  (!%p1493_p10), %s1826_s0, 64, %s111_s19, [#allocation3]  }
  0x28   : > { %p1837_p1 = scmp.ne.s32.totalorder %s1836_s23, 0  ;;  %p55_p2 = scmp.eq.s32.totalorder %s1420_s12, 0 }
  0x29   : > { %p1838_p4 = scmp.ne.s32.totalorder %s1416_s11, %s1412_s10  ;;  %p1839_p6 = scmp.eq.s32.totalorder %s1463_s13, 3 }
  0x2a   : > { %s1525_s7 = scalar_select %p1837_p1, %s1416_s11, %s47_s24  }
  0x2b   : > { %p1533_p8 = por %p1839_p6, %p1838_p4  ;;  %p1234_p11 = scmp.lt.s32.totalorder %s1420_s12, 4 }
  0x2c   : > { %s121_s14 = sand.u32 1, %s1416_s11   ;;  %p1841_p12 = pmov %p1838_p4 }
  0x2d   : > { %s1170_s18 = smul.u32 80, %s121_s14  ;;  %s122_s27 = scalar_lea.sflag [#allocation6], %s121_s14 }
  0x2e   : > { %p56_p13 = por %p55_p2, %p1841_p12  ;;  %s1168_s21 = smul.u32 1280, %s1420_s12 }
  0x2f   : > { %s125_s25 = scalar_lea.vmem [#allocation5], %s1170_s18  ;;  %s1325_s3 = scalar_lea.hbm %s1827_s1, 5120 }
  0x30   : > { %p1543_p0 = pnand %p1234_p11, %p56_p13  ;;  %s1550_s24 = scalar_lea.hbm %s1827_s1, %s1168_s21 }
  0x31   : > { %s133_s26 = sshll.u32 %s125_s25, 4  ;;  %s1320_s28 = scalar_lea.hbm %s1550_s24, 1280  ;;  %s1552_s26 = int_to_ptr.vmem [resolvable:$true] %s133_s26 }
  0x32   : > { %p1321_p10 = scmp.ne.s32.totalorder %s1550_s24, %s1320_s28  ;;  %p1322_p3 = pneg %p1543_p0 }
  0x33   : > { %p1326_p9 = scmp.lt.u32.totalorder %s1550_s24, %s1827_s1  ;;  %p1327_p1 = scmp.lt.u32.totalorder %s1325_s3, %s1320_s28 }
  0x34   : > { %p1323_p5 = pnand %p1322_p3, %p1321_p10  ;;  %p1329_p4 = scmp.lt.u32.totalorder %s1320_s28, %s1550_s24 }
  0x35   : > { %p1328_p2 = por %p1327_p1, %p1326_p9 }
  0x36   : > { %p1324_p7 = pneg %p1323_p5 }
  0x37   : > { %p1330_p6 = por %p1329_p4, %p1328_p2 }
  0x39   : > { %p1331_p11 = pnand %p1330_p6, %p1324_p7 }
  0x3b   : > { %1334 = shalt.err (!%p1331_p11)
}
  0x3c   : > { %s1335_s6 = scalar_lea.vmem %s1552_s26, 1280  ;;  %s1423_s14 = smov [#allocation5]  }
  0x3d   : > { %p1336_p12 = scmp.ne.s32.totalorder %s1552_s26, %s1335_s6  ;;  %s1340_s18 = sshll.u32 %s1423_s14, 4  ;;  %s1341_s18 = int_to_ptr.vmem [resolvable:$false] %s1340_s18 }
  0x3e   : > { %s1342_s21 = scalar_lea.vmem %s1341_s18, 2560  ;;  %p1343_p5 = scmp.lt.s32.totalorder %s1552_s26, %s1341_s18 }
  0x3f   : > { %p1338_p13 = pnand %p1336_p12, %p1322_p3  ;;  %p1344_p9 = scmp.lt.s32.totalorder %s1342_s21, %s1335_s6 }
  0x41   : > { %p1339_p10 = pneg %p1338_p13  ;;  %p1345_p1 = por %p1344_p9, %p1343_p5 }
  0x43   : > { %p1346_p2 = pnand %p1345_p1, %p1339_p10 }
  0x45   : > { %1349 = shalt.err (!%p1346_p2)
}
  0x46   : > { %1228 = dma.hbm_to_vmem [thread:$0]  (!%p1543_p0), %s1550_s24, 1280, %s1552_s26, %s122_s27  }
  0x47   : > { %p1843_p7 = scmp.ne.s32.totalorder %s1834_s17, 0 }
  0x48   : > { %p1844_p3 = scmp.eq.s32.totalorder (!%p1843_p7), %s1463_s13, 0 }
  0x49   : > { %142 = sbr.rel (%p1843_p7) target bundleno = 390 (0x186), region = 28 }
  0x50   : > { %1395 = dma.done.wait (%p1844_p3), [#allocation3], 64   ;;  %p1845_p4 = pmov %p1844_p3 }
  0x51   : > { %s1586_s19 = sand.u32 1, %s1412_s10   ;;  %p1846_p0 = scmp.ne.s32.totalorder %s1832_s15, 0 }
  0x52   : > { %1397 = vsyncadd (%p1845_p4), [#allocation3], 4294967232  ;;  %s1171_s23 = smul.u32 80, %s1586_s19  ;;  %s149_s22 = scalar_lea.sflag [#allocation6], %s1586_s19 }
  0x54   : > { %s1590_s25 = scalar_lea.vmem [#allocation5], %s1171_s23 }
  0x55   : > { %1399 = dma.done.wait (%p1846_p0), %s149_s22, 1280  }
  0x56   : > { %1401 = vsyncadd (%p1846_p0), %s149_s22, 4294966016  ;;  %v1424_v0 = vmov 0   ;;  %v1599_v1 = vld [vmem:[%s1590_s25] sm:$0xff]  ;;  %vm241_vm0 = vcmask 1043456   ;;  %v1602_v2 = vld [vmem:[%s1590_s25 + $0x8] sm:$0xff]  ;;  %vm237_vm1 = vcmask 64512   ;;  %v899_v44 = vlaneseq }
  0x57   : > { %334 = vmatprep.mubr.bf16.mxu0 %v1424_v0  ;;  %375 = vmatprep.mubr.bf16.mxu1 %v1424_v0  ;;  %v1126_v3 = vcombine.high %v1599_v1, %v1599_v1  ;;  %v1128_v4 = vcombine.high %v1602_v2, %v1602_v2  ;;  %v1125_v5 = vcombine.low %v1599_v1, %v1599_v1  ;;  %v1613_v7 = vld [vmem:[%s1590_s25 + $0x10] sm:$0xff]  ;;  %v1616_v8 = vld [vmem:[%s1590_s25 + $0x18] sm:$0xff]  ;;  %v1631_v15 = vld [vmem:[%s1590_s25 + $0x20] sm:$0xff]  ;;  %v1425_v42 = vmov 1966171168   ;;  %s1172_s15 = smul.u32 20, %s1586_s19 }
  0x58   : > { %v1127_v6 = vcombine.low %v1602_v2, %v1602_v2  ;;  %v1130_v9 = vcombine.high %v1613_v7, %v1613_v7  ;;  %v1132_v10 = vcombine.high %v1616_v8, %v1616_v8  ;;  %v1129_v11 = vcombine.low %v1613_v7, %v1613_v7  ;;  %v1634_v16 = vld [vmem:[%s1590_s25 + $0x28] sm:$0xff]  ;;  %v1655_v24 = vld [vmem:[%s1590_s25 + $0x30] sm:$0xff]  ;;  %v1658_v25 = vld [vmem:[%s1590_s25 + $0x38] sm:$0xff]  ;;  %s1169_s24 = smul.u32 320, %s1463_s13  ;;  %s1022_s30 = scalar_lea.sflag [#allocation4], %s1586_s19 }
  0x59   : > { %v1131_v12 = vcombine.low %v1616_v8, %v1616_v8  ;;  %1145 = vmatprep.subr.msk.bf16.mxu0 %vm241_vm0, %v1126_v3  ;;  %1147 = vmatprep.subr.msk.bf16.mxu1 %vm241_vm0, %v1128_v4  ;;  %v243_v13 = vsel %vm241_vm0, %v1125_v5, 0  ;;  %v186_v17 = vld [vmem:[#allocation2] sm:$0xf]  ;;  %v1134_v20 = vcombine.high %v1631_v15, %v1631_v15  ;;  %v1136_v21 = vcombine.high %v1634_v16, %v1634_v16  ;;  %v1677_v32 = vld [vmem:[%s1590_s25 + $0x40] sm:$0xff]  ;;  %s1765_s17 = scalar_lea.vmem [#allocation7], %s1172_s15  ;;  %s1426_s13 = smov [#allocation7]  }
  0x5a   : > { %v249_v14 = vsel %vm241_vm0, %v1127_v6, 0  ;;  %303 = vmatpush1.bf16.msra.mxu0 %v243_v13  ;;  %v255_v18 = vsel %vm241_vm0, %v1129_v11, 0  ;;  %v1133_v22 = vcombine.low %v1631_v15, %v1631_v15  ;;  %v1135_v23 = vcombine.low %v1634_v16, %v1634_v16  ;;  %v1680_v33 = vld [vmem:[%s1590_s25 + $0x48] sm:$0xff]  ;;  %s1036_s26 = sshll.u32 %s1765_s17, 4  ;;  %s1782_s29 = scalar_lea.hbm %s1828_s2, %s1169_s24  ;;  %s1784_s26 = int_to_ptr.vmem [resolvable:$true] %s1036_s26 }
  0x5b   : > { %344 = vmatpush1.bf16.msra.mxu1 %v249_v14  ;;  %1149 = vmatprep.subr.msk.bf16.mxu0 %vm241_vm0, %v1130_v9  ;;  %v261_v19 = vsel %vm241_vm0, %v1131_v12, 0  ;;  %v1138_v28 = vcombine.high %v1655_v24, %v1655_v24  ;;  %v1140_v29 = vcombine.high %v1658_v25, %v1658_v25  ;;  %v1137_v30 = vcombine.low %v1655_v24, %v1655_v24  ;;  %s1350_s3 = scalar_lea.vmem %s1784_s26, 320  ;;  %s1354_s4 = sshll.u32 %s1426_s13, 4  ;;  %s1355_s4 = int_to_ptr.vmem [resolvable:$false] %s1354_s4 }
  0x5c   : > { %1151 = vmatprep.subr.msk.bf16.mxu1 %vm241_vm0, %v1132_v10  ;;  %v267_v26 = vsel %vm241_vm0, %v1133_v22, 0  ;;  %v273_v27 = vsel %vm241_vm0, %v1135_v23, 0  ;;  %v1139_v31 = vcombine.low %v1658_v25, %v1658_v25  ;;  %v1142_v36 = vcombine.high %v1677_v32, %v1677_v32  ;;  %p1351_p6 = scmp.ne.s32.totalorder %s1784_s26, %s1350_s3  ;;  %s1356_s5 = scalar_lea.vmem %s1355_s4, 640 }
  0x5d   : > { %1146 = vmatmul.mubr.msk.bf16.vlgmr.msra.gmra.mrb[0].mxu0 %vm237_vm1, %v186_v17  ;;  %v279_v34 = vsel %vm241_vm0, %v1137_v30, 0  ;;  %v1144_v37 = vcombine.high %v1680_v33, %v1680_v33  ;;  %v1141_v38 = vcombine.low %v1677_v32, %v1677_v32  ;;  %v1143_v39 = vcombine.low %v1680_v33, %v1680_v33  ;;  %p1357_p13 = scmp.lt.s32.totalorder %s1784_s26, %s1355_s4  ;;  %p1358_p10 = scmp.lt.s32.totalorder %s1356_s5, %s1350_s3 }
  0x5e   : > { %1148 = vmatmul.mubr.msk.bf16.vlgmr.msra.gmra.mrb[0].mxu1 %vm237_vm1, %v186_v17  ;;  %385 = vmatpush1.bf16.msra.mxu0 %v255_v18  ;;  %v285_v35 = vsel %vm241_vm0, %v1139_v31, 0  ;;  %v897_v43 = vunpack.c.l.s4 %v1425_v42  ;;  %v712_v45 = vunpack.c.l.bf16 %v1599_v1  ;;  %v714_v46 = vunpack.c.l.bf16 %v1602_v2  ;;  %p1352_p11 = pnand %p1351_p6, %p1533_p8 }
  0x5f   : > { %426 = vmatpush1.bf16.msra.mxu1 %v261_v19  ;;  %416 = vmatprep.mubr.bf16.mxu0 %v1424_v0  ;;  %v291_v40 = vsel %vm241_vm0, %v1141_v38, 0  ;;  %v297_v41 = vsel %vm241_vm0, %v1143_v39, 0  ;;  %v713_v47 = vunpack.c.h.bf16 %v1599_v1  ;;  %v715_v48 = vunpack.c.h.bf16 %v1602_v2  ;;  %p1359_p5 = por %p1358_p10, %p1357_p13 }
  0x60   : > { %457 = vmatprep.mubr.bf16.mxu1 %v1424_v0  ;;  %1153 = vmatprep.subr.msk.bf16.mxu0 %vm241_vm0, %v1134_v20  ;;  %v898_v51 = vunpack.c.0.s8 %v897_v43  ;;  %v900_v52 = vshrl.u32 %v899_v44, 7  ;;  %v716_v57 = vunpack.c.l.bf16 %v1613_v7  ;;  %v718_v58 = vunpack.c.l.bf16 %v1616_v8  ;;  %p1353_p12 = pneg %p1352_p11 }
  0x61   : > { %1155 = vmatprep.subr.msk.bf16.mxu1 %vm241_vm0, %v1136_v21  ;;  %v717_v63 = vunpack.c.h.bf16 %v1613_v7  ;;  %v720_v5 = vunpack.c.l.bf16 %v1631_v15  ;;  %v722_v6 = vunpack.c.l.bf16 %v1634_v16  ;;  %v721_v12 = vunpack.c.h.bf16 %v1631_v15 }
  0x62   : > { %v1717_v10 = vsub.s32 %v898_v51, %v900_v52  ;;  %v723_v7 = vunpack.c.h.bf16 %v1634_v16  ;;  %v726_v19 = vunpack.c.l.bf16 %v1658_v25  ;;  %v725_v20 = vunpack.c.h.bf16 %v1655_v24  ;;  %p1360_p9 = pnand %p1359_p5, %p1353_p12 }
  0x63   : > { %v727_v23 = vunpack.c.h.bf16 %v1658_v25  ;;  %v730_v31 = vunpack.c.l.bf16 %v1680_v33  ;;  %vm1018_vm2 = vcmp.lt.s32.totalorder %v899_v44, 512 }
  0x65   : > { %1150 = vmatmul.mubr.msk.bf16.vlgmr.msra.gmra.mrb[4].mxu0 %vm237_vm1, %v186_v17 }
  0x66   : > { %1152 = vmatmul.mubr.msk.bf16.vlgmr.msra.gmra.mrb[4].mxu1 %vm237_vm1, %v186_v17  ;;  %467 = vmatpush1.bf16.msra.mxu0 %v267_v26  ;;  %v728_v26 = vunpack.c.l.bf16 %v1677_v32 }
  0x67   : > { %508 = vmatpush1.bf16.msra.mxu1 %v273_v27  ;;  %498 = vmatprep.mubr.bf16.mxu0 %v1424_v0 }
  0x68   : > { %539 = vmatprep.mubr.bf16.mxu1 %v1424_v0  ;;  %1157 = vmatprep.subr.msk.bf16.mxu0 %vm241_vm0, %v1138_v28 }
  0x69   : > { %1159 = vmatprep.subr.msk.bf16.mxu1 %vm241_vm0, %v1140_v29 }
  0x6d   : > { %1154 = vmatmul.mubr.msk.bf16.vlgmr.msra.gmra.mrb[8].mxu0 %vm237_vm1, %v186_v17 }
  0x6e   : > { %1156 = vmatmul.mubr.msk.bf16.vlgmr.msra.gmra.mrb[8].mxu1 %vm237_vm1, %v186_v17  ;;  %549 = vmatpush1.bf16.msra.mxu0 %v279_v34  ;;  %v729_v34 = vunpack.c.h.bf16 %v1677_v32 }
  0x6f   : > { %590 = vmatpush1.bf16.msra.mxu1 %v285_v35  ;;  %580 = vmatprep.mubr.bf16.mxu0 %v1424_v0 }
  0x70   : > { %621 = vmatprep.mubr.bf16.mxu1 %v1424_v0  ;;  %1161 = vmatprep.subr.msk.bf16.mxu0 %vm241_vm0, %v1142_v36 }
  0x71   : > { %1163 = vmatprep.subr.msk.bf16.mxu1 %vm241_vm0, %v1144_v37 }
  0x75   : > { %1158 = vmatmul.mubr.msk.bf16.vlgmr.msra.gmra.mrb[12].mxu0 %vm237_vm1, %v186_v17 }
  0x76   : > { %1160 = vmatmul.mubr.msk.bf16.vlgmr.msra.gmra.mrb[12].mxu1 %vm237_vm1, %v186_v17  ;;  %631 = vmatpush1.bf16.msra.mxu0 %v291_v40 }
  0x77   : > { %672 = vmatpush1.bf16.msra.mxu1 %v297_v41  ;;  %662 = vmatprep.mubr.bf16.mxu0 %v1424_v0 }
  0x78   : > { %703 = vmatprep.mubr.bf16.mxu1 %v1424_v0  ;;  %v719_v0 = vunpack.c.h.bf16 %v1616_v8  ;;  %v724_v8 = vunpack.c.l.bf16 %v1655_v24 }
  0x7d   : > { %1162 = vmatmul.mubr.msk.bf16.vlgmr.msra.gmra.mrb[16].mxu0 %vm237_vm1, %v186_v17 }
  0x7e   : > { %1164 = vmatmul.mubr.msk.bf16.vlgmr.msra.gmra.mrb[16].mxu1 %vm237_vm1, %v186_v17 }
 0x130   : > { %v336_v49 = vpop.f32.mrb[0].mxu0 }
 0x131   : > { %v377_v50 = vpop.f32.mrb[0].mxu1  ;;  %v732_v53 = vmul.f32 %v712_v45, %v336_v49  ;;  %v338_v55 = vpop.f32.mrb[1].mxu0 }
 0x132   : > { %v734_v54 = vmul.f32 %v714_v46, %v377_v50  ;;  %v379_v56 = vpop.f32.mrb[1].mxu1  ;;  %v733_v59 = vmul.f32 %v713_v47, %v338_v55  ;;  %v340_v61 = vpop.f32.mrb[2].mxu0 }
 0x133   : > { %v735_v60 = vmul.f32 %v715_v48, %v379_v56  ;;  %v381_v62 = vpop.f32.mrb[2].mxu1  ;;  %v752_v1 = vrot.slane %v732_v53, 4  ;;  %v341_v3 = vpop.f32.mrb[3].mxu0 }
 0x134   : > { %v764_v2 = vrot.slane %v734_v54, 4  ;;  %v382_v4 = vpop.f32.mrb[3].mxu1  ;;  %v758_v9 = vrot.slane %v733_v59, 4 }
 0x135   : > { %v770_v11 = vrot.slane %v735_v60, 4  ;;  %v753_v13 = vadd.f32 %v752_v1, %v732_v53 }
 0x136   : > { %v765_v14 = vadd.f32 %v764_v2, %v734_v54  ;;  %v759_v17 = vadd.f32 %v758_v9, %v733_v59 }
 0x137   : > { %v771_v18 = vadd.f32 %v770_v11, %v735_v60  ;;  %v754_v21 = vrot.slane %v753_v13, 2 }
 0x138   : > { %v766_v22 = vrot.slane %v765_v14, 2  ;;  %v760_v27 = vrot.slane %v759_v17, 2  ;;  %v418_v29 = vpop.f32.mrb[4].mxu0 }
 0x139   : > { %v772_v28 = vrot.slane %v771_v18, 2  ;;  %v459_v30 = vpop.f32.mrb[4].mxu1  ;;  %v755_v35 = vadd.f32 %v754_v21, %v753_v13  ;;  %v736_v37 = vmul.f32 %v716_v57, %v418_v29  ;;  %v420_v39 = vpop.f32.mrb[5].mxu0 }
 0x13a   : > { %v767_v36 = vadd.f32 %v766_v22, %v765_v14  ;;  %v738_v38 = vmul.f32 %v718_v58, %v459_v30  ;;  %v461_v40 = vpop.f32.mrb[5].mxu1  ;;  %v761_v41 = vadd.f32 %v760_v27, %v759_v17  ;;  %v737_v43 = vmul.f32 %v717_v63, %v420_v39  ;;  %v422_v46 = vpop.f32.mrb[6].mxu0 }
 0x13b   : > { %v773_v42 = vadd.f32 %v772_v28, %v771_v18  ;;  %v739_v45 = vmul.f32 %v719_v0, %v461_v40  ;;  %v463_v47 = vpop.f32.mrb[6].mxu1  ;;  %v756_v48 = vrot.slane %v755_v35, 1  ;;  %v776_v50 = vrot.slane %v736_v37, 4  ;;  %v423_v52 = vpop.f32.mrb[7].mxu0 }
 0x13c   : > { %v768_v49 = vrot.slane %v767_v36, 1  ;;  %v788_v51 = vrot.slane %v738_v38, 4  ;;  %v464_v53 = vpop.f32.mrb[7].mxu1  ;;  %v762_v54 = vrot.slane %v761_v41, 1  ;;  %v782_v56 = vrot.slane %v737_v43, 4 }
 0x13d   : > { %v774_v55 = vrot.slane %v773_v42, 1  ;;  %v794_v59 = vrot.slane %v739_v45, 4  ;;  %v757_v57 = vadd.f32 %v756_v48, %v755_v35  ;;  %v777_v60 = vadd.f32 %v776_v50, %v736_v37 }
 0x13e   : > { %v769_v58 = vadd.f32 %v768_v49, %v767_v36  ;;  %v789_v61 = vadd.f32 %v788_v51, %v738_v38  ;;  %v763_v62 = vadd.f32 %v762_v54, %v761_v41  ;;  %v783_v63 = vadd.f32 %v782_v56, %v737_v43 }
 0x13f   : > { %v775_v1 = vadd.f32 %v774_v55, %v773_v42  ;;  %v795_v0 = vadd.f32 %v794_v59, %v739_v45  ;;  %v1173_v2 = vtrunc.f32 %v757_v57  ;;  %v778_v4 = vrot.slane %v777_v60, 2 }
 0x140   : > { %v1177_v3 = vtrunc.f32 %v769_v58  ;;  %v790_v9 = vrot.slane %v789_v61, 2  ;;  %v1175_v11 = vtrunc.f32 %v763_v62  ;;  %v784_v14 = vrot.slane %v783_v63, 2  ;;  %v500_v18 = vpop.f32.mrb[8].mxu0 }
 0x141   : > { %v1179_v13 = vtrunc.f32 %v775_v1  ;;  %v796_v17 = vrot.slane %v795_v0, 2  ;;  %v541_v21 = vpop.f32.mrb[8].mxu1  ;;  %v1174_v22 = vcvt.f32.s32 %v1173_v2  ;;  %v779_v28 = vadd.f32 %v778_v4, %v777_v60  ;;  %v502_v30 = vpop.f32.mrb[9].mxu0 }
 0x142   : > { %v1178_v27 = vcvt.f32.s32 %v1177_v3  ;;  %v791_v29 = vadd.f32 %v790_v9, %v789_v61  ;;  %v543_v35 = vpop.f32.mrb[9].mxu1  ;;  %v1176_v36 = vcvt.f32.s32 %v1175_v11  ;;  %v785_v38 = vadd.f32 %v784_v14, %v783_v63  ;;  %v504_v40 = vpop.f32.mrb[10].mxu0 }
 0x143   : > { %v1180_v37 = vcvt.f32.s32 %v1179_v13  ;;  %v797_v39 = vadd.f32 %v796_v17, %v795_v0  ;;  %v545_v41 = vpop.f32.mrb[10].mxu1  ;;  %v780_v42 = vrot.slane %v779_v28, 1  ;;  %v740_v45 = vmul.f32 %v720_v5, %v500_v18  ;;  %v505_v47 = vpop.f32.mrb[11].mxu0 }
 0x144   : > { %v792_v43 = vrot.slane %v791_v29, 1  ;;  %v742_v46 = vmul.f32 %v722_v6, %v541_v21  ;;  %v546_v48 = vpop.f32.mrb[11].mxu1  ;;  %v892_v49 = vcombine.low %v1174_v22, %v1176_v36  ;;  %v786_v51 = vrot.slane %v785_v38, 1 }
 0x145   : > { %v893_v50 = vcombine.low %v1178_v27, %v1180_v37  ;;  %v798_v52 = vrot.slane %v797_v39, 1  ;;  %v781_v53 = vadd.f32 %v780_v42, %v779_v28  ;;  %v800_v55 = vrot.slane %v740_v45, 4 }
 0x146   : > { %v793_v54 = vadd.f32 %v792_v43, %v791_v29  ;;  %v812_v56 = vrot.slane %v742_v46, 4  ;;  %v902_v59 = vrot.slane %v892_v49, %v1717_v10  ;;  %v787_v58 = vadd.f32 %v786_v51, %v785_v38 }
 0x147   : > { %v909_v57 = vrot.slane %v893_v50, %v1717_v10  ;;  %v799_v60 = vadd.f32 %v798_v52, %v797_v39  ;;  %v1181_v5 = vtrunc.f32 %v781_v53  ;;  %v801_v62 = vadd.f32 %v800_v55, %v740_v45 }
 0x148   : > { %v1185_v61 = vtrunc.f32 %v793_v54  ;;  %v813_v6 = vadd.f32 %v812_v56, %v742_v46  ;;  %v1183_v63 = vtrunc.f32 %v787_v58  ;;  %v741_v2 = vmul.f32 %v721_v12, %v502_v30  ;;  %v582_v3 = vpop.f32.mrb[12].mxu0 }
 0x149   : > { %v924_v1 = vcombine.low %v902_v59, %v909_v57  ;;  %v1187_v0 = vtrunc.f32 %v799_v60  ;;  %v623_v4 = vpop.f32.mrb[12].mxu1  ;;  %v1182_v9 = vcvt.f32.s32 %v1181_v5  ;;  %v802_v13 = vrot.slane %v801_v62, 2  ;;  %v584_v17 = vpop.f32.mrb[13].mxu0 }
 0x14a   : > { %v1186_v11 = vcvt.f32.s32 %v1185_v61  ;;  %v814_v14 = vrot.slane %v813_v6, 2  ;;  %v625_v18 = vpop.f32.mrb[13].mxu1  ;;  %v1184_v21 = vcvt.f32.s32 %v1183_v63  ;;  %v806_v27 = vrot.slane %v741_v2, 4  ;;  %v586_v28 = vpop.f32.mrb[14].mxu0 }
 0x14b   : > { %v1188_v22 = vcvt.f32.s32 %v1187_v0  ;;  %v627_v29 = vpop.f32.mrb[14].mxu1  ;;  %v731_v36 = vunpack.c.h.bf16 %v1680_v33  ;;  %v803_v37 = vadd.f32 %v802_v13, %v801_v62  ;;  %v743_v15 = vmul.f32 %v723_v7, %v543_v35  ;;  %v587_v30 = vpop.f32.mrb[15].mxu0 }
 0x14c   : > { %v815_v38 = vadd.f32 %v814_v14, %v813_v6  ;;  %v744_v12 = vmul.f32 %v724_v8, %v582_v3  ;;  %v628_v39 = vpop.f32.mrb[15].mxu1  ;;  %v894_v40 = vcombine.low %v1182_v9, %v1184_v21  ;;  %v807_v42 = vadd.f32 %v806_v27, %v741_v2 }
 0x14d   : > { %v895_v41 = vcombine.low %v1186_v11, %v1188_v22  ;;  %v746_v43 = vmul.f32 %v726_v19, %v623_v4  ;;  %v804_v45 = vrot.slane %v803_v37, 1  ;;  %v818_v47 = vrot.slane %v743_v15, 4 }
 0x14e   : > { %v816_v46 = vrot.slane %v815_v38, 1  ;;  %v824_v48 = vrot.slane %v744_v12, 4  ;;  %v916_v49 = vrot.slane %v894_v40, %v1717_v10  ;;  %v808_v7 = vrot.slane %v807_v42, 2 }
 0x14f   : > { %v923_v16 = vrot.slane %v895_v41, %v1717_v10  ;;  %v836_v35 = vrot.slane %v746_v43, 4  ;;  %v805_v50 = vadd.f32 %v804_v45, %v803_v37  ;;  %v819_v51 = vadd.f32 %v818_v47, %v743_v15 }
 0x150   : > { %v817_v8 = vadd.f32 %v816_v46, %v815_v38  ;;  %v825_v52 = vadd.f32 %v824_v48, %v744_v12  ;;  %v809_v54 = vadd.f32 %v808_v7, %v807_v42  ;;  %v745_v19 = vmul.f32 %v725_v20, %v584_v17  ;;  %v664_v56 = vpop.f32.mrb[16].mxu0 }
 0x151   : > { %v925_v53 = vcombine.low %v916_v49, %v923_v16  ;;  %v837_v55 = vadd.f32 %v836_v35, %v746_v43  ;;  %v705_v59 = vpop.f32.mrb[16].mxu1  ;;  %v1189_v57 = vtrunc.f32 %v805_v50  ;;  %v820_v60 = vrot.slane %v819_v51, 2  ;;  %v666_v61 = vpop.f32.mrb[17].mxu0 }
 0x152   : > { %v1193_v58 = vtrunc.f32 %v817_v8  ;;  %v826_v5 = vrot.slane %v825_v52, 2  ;;  %v707_v62 = vpop.f32.mrb[17].mxu1  ;;  %v1748_v6 = vrot.slane %v924_v1, %v1717_v10  ;;  %v810_v63 = vrot.slane %v809_v54, 1  ;;  %v668_v3 = vpop.f32.mrb[18].mxu0 }
 0x153   : > { %v838_v0 = vrot.slane %v837_v55, 2  ;;  %v830_v2 = vrot.slane %v745_v19, 4  ;;  %v709_v4 = vpop.f32.mrb[18].mxu1  ;;  %v1190_v9 = vcvt.f32.s32 %v1189_v57  ;;  %v821_v24 = vadd.f32 %v820_v60, %v819_v51  ;;  %v669_v13 = vpop.f32.mrb[19].mxu0 }
 0x154   : > { %v1194_v11 = vcvt.f32.s32 %v1193_v58  ;;  %v827_v20 = vadd.f32 %v826_v5, %v825_v52  ;;  %v710_v14 = vpop.f32.mrb[19].mxu1  ;;  %v811_v17 = vadd.f32 %v810_v63, %v809_v54  ;;  %v747_v27 = vmul.f32 %v727_v23, %v625_v18 }
 0x155   : > { %v839_v21 = vadd.f32 %v838_v0, %v837_v55  ;;  %v831_v22 = vadd.f32 %v830_v2, %v745_v19  ;;  %v822_v28 = vrot.slane %v821_v24, 1  ;;  %v748_v29 = vmul.f32 %v728_v26, %v664_v56 }
 0x156   : > { %v828_v1 = vrot.slane %v827_v20, 1  ;;  %v750_v37 = vmul.f32 %v730_v31, %v705_v59  ;;  %v1191_v38 = vtrunc.f32 %v811_v17  ;;  %v842_v30 = vrot.slane %v747_v27, 4 }
 0x157   : > { %v840_v15 = vrot.slane %v839_v21, 1  ;;  %v832_v12 = vrot.slane %v831_v22, 2  ;;  %v823_v39 = vadd.f32 %v822_v28, %v821_v24  ;;  %v848_v41 = vrot.slane %v748_v29, 4 }
 0x158   : > { %v829_v40 = vadd.f32 %v828_v1, %v827_v20  ;;  %v860_v42 = vrot.slane %v750_v37, 4  ;;  %v1192_v43 = vcvt.f32.s32 %v1191_v38  ;;  %v843_v18 = vadd.f32 %v842_v30, %v747_v27 }
 0x159   : > { %v841_v25 = vadd.f32 %v840_v15, %v839_v21  ;;  %v833_v23 = vadd.f32 %v832_v12, %v831_v22  ;;  %v1195_v45 = vtrunc.f32 %v823_v39  ;;  %v849_v47 = vadd.f32 %v848_v41, %v748_v29 }
 0x15a   : > { %v1197_v46 = vtrunc.f32 %v829_v40  ;;  %v861_v26 = vadd.f32 %v860_v42, %v750_v37  ;;  %v939_v31 = vrot.slane %v925_v53, %v1717_v10  ;;  %v941_v48 = vcombine.low %v1190_v9, %v1192_v43 }
 0x15b   : > { %v834_v49 = vrot.slane %v833_v23, 1  ;;  %v844_v16 = vrot.slane %v843_v18, 2  ;;  %v1196_v7 = vcvt.f32.s32 %v1195_v45  ;;  %v1201_v35 = vtrunc.f32 %v841_v25 }
 0x15c   : > { %v850_v50 = vrot.slane %v849_v47, 2  ;;  %v862_v8 = vrot.slane %v861_v26, 2  ;;  %v951_v51 = vrot.slane %v941_v48, %v1717_v10  ;;  %v1198_v52 = vcvt.f32.s32 %v1197_v46 }
 0x15d   : > { %v835_v54 = vadd.f32 %v834_v49, %v833_v23  ;;  %v845_v55 = vadd.f32 %v844_v16, %v843_v18  ;;  %v942_v19 = vcombine.low %v1194_v11, %v1196_v7  ;;  %v749_v57 = vmul.f32 %v729_v34, %v666_v61 }
 0x15e   : > { %v851_v56 = vadd.f32 %v850_v50, %v849_v47  ;;  %v863_v59 = vadd.f32 %v862_v8, %v861_v26  ;;  %v751_v60 = vmul.f32 %v731_v36, %v707_v62  ;;  %v940_v5 = vcombine.low %v1748_v6, %v939_v31 }
 0x15f   : > { %v1199_v58 = vtrunc.f32 %v835_v54  ;;  %v846_v53 = vrot.slane %v845_v55, 1  ;;  %v958_v63 = vrot.slane %v942_v19, %v1717_v10  ;;  %v854_v2 = vrot.slane %v749_v57, 4 }
 0x160   : > { %v852_v0 = vrot.slane %v851_v56, 1  ;;  %v864_v9 = vrot.slane %v863_v59, 1  ;;  %v866_v11 = vrot.slane %v751_v60, 4  ;;  %1014 = vst [vmem:[%s1765_s17] sm:$0xff] %v940_v5  ;;  %v1202_v61 = vcvt.f32.s32 %v1201_v35 }
 0x161   : > { %v1200_v3 = vcvt.f32.s32 %v1199_v58  ;;  %v847_v4 = vadd.f32 %v846_v53, %v845_v55  ;;  %v973_v32 = vcombine.low %v951_v51, %v958_v63  ;;  %v855_v34 = vadd.f32 %v854_v2, %v749_v57 }
 0x162   : > { %v867_v36 = vadd.f32 %v866_v11, %v751_v60  ;;  %v853_v62 = vadd.f32 %v852_v0, %v851_v56  ;;  %v865_v13 = vadd.f32 %v864_v9, %v863_v59 }
 0x163   : > { %v943_v24 = vcombine.low %v1198_v52, %v1200_v3  ;;  %v1203_v33 = vtrunc.f32 %v847_v4  ;;  %v856_v6 = vrot.slane %v855_v34, 2  ;;  %v981_v41 = vrot.slane %v973_v32, %v1717_v10 }
 0x164   : > { %v868_v14 = vrot.slane %v867_v36, 2  ;;  %v1205_v28 = vtrunc.f32 %v853_v62  ;;  %v1209_v37 = vtrunc.f32 %v865_v13 }
 0x165   : > { %v1204_v20 = vcvt.f32.s32 %v1203_v33  ;;  %v857_v17 = vadd.f32 %v856_v6, %v855_v34  ;;  %v965_v21 = vrot.slane %v943_v24, %v1717_v10 }
 0x166   : > { %v869_v27 = vadd.f32 %v868_v14, %v867_v36  ;;  %v1206_v39 = vcvt.f32.s32 %v1205_v28  ;;  %v1210_v43 = vcvt.f32.s32 %v1209_v37 }
 0x167   : > { %v944_v22 = vcombine.low %v1202_v61, %v1204_v20  ;;  %v858_v1 = vrot.slane %v857_v17, 1 }
 0x168   : > { %v870_v38 = vrot.slane %v869_v27, 1 }
 0x169   : > { %v972_v29 = vrot.slane %v944_v22, %v1717_v10  ;;  %v859_v15 = vadd.f32 %v858_v1, %v857_v17 }
 0x16a   : > { %v871_v30 = vadd.f32 %v870_v38, %v869_v27 }
 0x16b   : > { %v974_v12 = vcombine.low %v965_v21, %v972_v29  ;;  %v1207_v40 = vtrunc.f32 %v859_v15 }
 0x16c   : > { %v1211_v25 = vtrunc.f32 %v871_v30 }
 0x16d   : > { %v988_v42 = vrot.slane %v974_v12, %v1717_v10  ;;  %v1208_v23 = vcvt.f32.s32 %v1207_v40 }
 0x16e   : > { %v1212_v18 = vcvt.f32.s32 %v1211_v25 }
 0x16f   : > { %v989_v45 = vcombine.low %v981_v41, %v988_v42  ;;  %v990_v46 = vcombine.low %v1206_v39, %v1208_v23 }
 0x170   : > { %v991_v47 = vcombine.low %v1210_v43, %v1212_v18 }
 0x171   : > { %1015 = vst [vmem:[%s1765_s17 + $0x8] sm:$0xff] %v989_v45  ;;  %v998_v26 = vrot.slane %v990_v46, %v1717_v10 }
 0x172   : > { %v1005_v31 = vrot.slane %v991_v47, %v1717_v10 }
 0x174   : > { %v1006_v48 = vcombine.low %v998_v26, %v1005_v31 }
 0x176   : > { %v1013_v49 = vrot.slane %v1006_v48, %v1717_v10 }
 0x178   : > { %1020 = vst.msk [vmem:[%s1765_s17 + $0x10] sm:$0xf] %vm1018_vm2, %v1013_v49 }
 0x179   : > { %1363 = shalt.err (!%p1360_p9)
}
 0x17a   : > { %s1364_s6 = scalar_lea.hbm %s1782_s29, 320  ;;  %s1368_s21 = scalar_lea.hbm %s1828_s2, 1280 }
 0x17b   : > { %p1365_p1 = scmp.ne.s32.totalorder %s1782_s29, %s1364_s6  ;;  %p1369_p3 = scmp.lt.u32.totalorder %s1782_s29, %s1828_s2 }
 0x17c   : > { %p1370_p4 = scmp.lt.u32.totalorder %s1368_s21, %s1364_s6  ;;  %p1372_p6 = scmp.lt.u32.totalorder %s1364_s6, %s1782_s29 }
 0x17d   : > { %p1366_p2 = pnand %p1365_p1, %p1533_p8 }
 0x17e   : > { %p1371_p0 = por %p1370_p4, %p1369_p3 }
 0x17f   : > { %p1367_p7 = pneg %p1366_p2 }
 0x180   : > { %p1373_p11 = por %p1372_p6, %p1371_p0 }
 0x182   : > { %p1374_p12 = pnand %p1373_p11, %p1367_p7 }
 0x184   : > { %1377 = shalt.err (!%p1374_p12)
}
 0x185   : > { %1219 = dma.vmem_to_hbm [thread:$0]  (%p1533_p8), %s1784_s26, 320, %s1782_s29, %s1022_s30  }
 0x186 PF: > { %p1236_p13 = scmp.ge.s32.totalorder %s1420_s12, 2  ;;  %s1048_s22 = sand.u32 1, %s1408_s9  }
 0x187   : > { %p1847_p10 = scmp.ne.s32.totalorder %s1833_s16, 0  ;;  %s1049_s25 = scalar_lea.sflag [#allocation4], %s1048_s22 }
 0x189   : > { %p1230_p5 = pnand %p1236_p13, %p1847_p10 }
 0x18b   : > { %1403 = dma.done.wait (!%p1230_p5), %s1049_s25, 320  }
 0x18c   : > { %1405 = vsyncadd (!%p1230_p5), %s1049_s25, 4294966976  ;;  %p16_p9 = scmp.ge.s32.totalorder %s1489_s20, 6   ;;  %s1848_s9 = smov %s1412_s10 }
 0x18d   : > { %s1849_s10 = smov %s1416_s11  ;;  %s1850_s11 = smov %s1525_s7 }
 0x18e   : > { %s1851_s12 = smov %s1489_s20  ;;  %18 = sbr.rel (!%p16_p9) target bundleno = 6 (0x6), region = 78 }
 0x195   :  { %1054 = vsyncpa [#allocation3], 1 }
 0x196   :  { %1056 = vsyncpa [#allocation3 + $0x1], 1 }
 0x197   :  { %1057 = vsyncpa [#allocation6], 1 }
 0x198   :  { %1059 = vsyncpa [#allocation6 + $0x1], 1 }
 0x199   :  { %1060 = vsyncpa [#allocation4], 1 }
 0x19a   :  { %1062 = vsyncpa [#allocation4 + $0x1], 1 }

</bundles_post_ra>
